<compile_context>
chip_gen: v7x
topology: tpu7x:2x2x1
jax: 0.10.0
libtpu: 0.0.40
codegen_flags: <defaults>
</compile_context>

<pallas_src>
import jax
import jax.numpy as jnp
import numpy as np
from jax.experimental import pallas as pl
from jax.experimental.pallas import tpu as pltpu

LANE = 128
PACK = LANE // 4                         # 32 original rows packed per lane-dense row
DEFAULT_TILE_ROWS = 8192                 # packed rows per grid step (4 MiB / f32 buffer)
MAX_TILE_VMEM_BYTES = 24 * 1024 * 1024   # cap for double-buffered in+out tiles (v7x safe)
VMEM_LIMIT_BYTES = 32 * 1024 * 1024      # explicit scoped-VMEM limit (v5e default is 16 MiB)

_EYE_PACK = np.eye(PACK, dtype=np.float32)   # compile-time constant for the kron


def math_layer_kernel(x_ref, w_ref, o_ref):
    # x_ref: (tile, 128) -- 32 original rows x 4 features interleaved along lanes
    # w_ref: (128, 128)  -- block-diagonal replication of W^T (32 copies of 4x4)
    # o_ref: (tile, 128)
    x = x_ref[...].astype(jnp.float32)   # bf16 inputs are upcast in-register, not in HBM
    # HIGHEST: no bf16 truncation of the f32 operands on the MXU (reference parity);
    # the extra MXU passes are fully hidden under HBM time at these tile sizes.
    y = jnp.dot(x, w_ref[...],
                preferred_element_type=jnp.float32,
                precision=jax.lax.Precision.HIGHEST)

    # Lane's column id: lane % 4 (0: identity, 1: exp, 2: sin, 3: log).
    col = jax.lax.broadcasted_iota(jnp.int32, (1, LANE), 1) % 4

    # Clamp the *arguments* so no NaN/Inf is produced and threshold inclusivity
    # matches the reference exactly: y >= 4 -> exp(4); y <= 0.005 -> log(0.005).
    exp_y = jnp.exp(jnp.minimum(y, 4.0))
    sin_y = jnp.sin(y)                          # k_sin * sin, k_sin = 1
    log_y = jnp.log(jnp.maximum(y, 0.005))
    # TODO(synk): on v7x a feature-major (column-grouped) layout would cut these
    # full-width transcendentals 4x, but only if the relayout is free upstream.

    out = jnp.where(col == 1, exp_y, y)
    out = jnp.where(col == 2, sin_y, out)
    out = jnp.where(col == 3, log_y, out)
    o_ref[...] = out.astype(o_ref.dtype)


def _choose_tile(r_pad, tile_rows, sub, itemsize):
    # Double-buffered input + output tiles must fit the VMEM budget.
    bytes_per_packed_row = 2 * LANE * itemsize + 2 * LANE * itemsize
    max_tile = max(sub, (MAX_TILE_VMEM_BYTES // bytes_per_packed_row) // sub * sub)
    tile = min(int(tile_rows), r_pad, max_tile)
    return max(sub, (tile // sub) * sub)


def math_layer_forward(x, weight, *, tile_rows=DEFAULT_TILE_ROWS):
    """x: (..., 4); weight: (4, 4) torch-style Linear weight (out_features, in_features)."""
    assert x.shape[-1] == 4 and weight.shape == (4, 4), "math_layer uses a 4 -> 4 linear"

    # Keep bf16 inputs narrow through the DMA (halves HBM traffic); otherwise f32.
    io_dtype = jnp.bfloat16 if x.dtype == jnp.bfloat16 else jnp.float32
    itemsize = jnp.dtype(io_dtype).itemsize
    sub = 8 if itemsize == 4 else 16            # sublane granularity for the tiles

    x2d = x.reshape(-1, 4).astype(io_dtype)
    n = x2d.shape[0]

    # Pad only to the packing quantum (NOT to a whole tile): for typical N this is a
    # no-op, so no extra HBM pass from jnp.pad and no output-slice copy afterwards.
    row_quantum = PACK * sub                    # 256 rows (f32) / 512 rows (bf16)
    n_pad = pl.cdiv(n, row_quantum) * row_quantum
    if n_pad != n:
        x2d = jnp.pad(x2d, ((0, n_pad - n), (0, 0)))
    r_pad = n_pad // PACK
    x_packed = x2d.reshape(r_pad, LANE)         # free row-major repack -> lane-dense slab

    tile = _choose_tile(r_pad, tile_rows, sub, itemsize)
    n_blocks = pl.cdiv(r_pad, tile)             # ragged last block handled by Pallas masking

    # 32 copies of W^T on the diagonal: x_packed @ w_big == (x @ W^T) re-packed.
    wt = weight.T.astype(jnp.float32)           # (in=4, out=4)
    w_big = jnp.kron(_EYE_PACK, wt)             # (128, 128), off-diagonal exact zeros

    cost = pl.CostEstimate(
        flops=2 * n_blocks * tile * LANE * LANE,
        transcendentals=3 * n_blocks * tile * LANE,
        bytes_accessed=2 * r_pad * LANE * itemsize + LANE * LANE * 4,
    )

    out = pl.pallas_call(
        math_layer_kernel,
        out_shape=jax.ShapeDtypeStruct((r_pad, LANE), io_dtype),
        grid=(n_blocks,),
        in_specs=[
            pl.BlockSpec((tile, LANE), lambda i: (i, 0)),
            pl.BlockSpec((LANE, LANE), lambda i: (0, 0)),   # constant block -> fetched once
        ],
        out_specs=pl.BlockSpec((tile, LANE), lambda i: (i, 0)),
        compiler_params=pltpu.CompilerParams(
            dimension_semantics=("parallel",),              # shards row tiles across TCs on v7x
            vmem_limit_bytes=VMEM_LIMIT_BYTES,
        ),
        cost_estimate=cost,
    )(x_packed, w_big)

    out = out.reshape(n_pad, 4)
    if n_pad != n:
        out = out[:n]
    return out.reshape(*x.shape[:-1], 4)


# ---------------- pure-JAX reference (for the smoke-tests below) ----------------

def math_layer_reference(x, weight):
    y = jnp.einsum("...i,oi->...o", x.astype(jnp.float32), weight.astype(jnp.float32),
                   precision=jax.lax.Precision.HIGHEST)
    return jnp.stack(
        [y[..., 0],
         jnp.exp(jnp.minimum(y[..., 1], 4.0)),
         jnp.sin(y[..., 2]),
         jnp.log(jnp.maximum(y[..., 3], 0.005))],
        axis=-1,
    )


def _check(y_kernel, x, weight):
    y_ref = math_layer_reference(x, weight)
    # HIGHEST-precision matmul on both paths -> ~10x tighter tolerances than before.
    ok012 = jnp.allclose(y_kernel[..., :3], y_ref[..., :3], rtol=5e-3, atol=5e-3)
    # Column 3: compare exp(log-output) (i.e. the clamped pre-log value) so the steep
    # 1/x slope right at the 0.005 clamp doesn't amplify last-ulp matmul differences.
    ok3 = jnp.allclose(jnp.exp(y_kernel[..., 3]), jnp.exp(y_ref[..., 3]),
                       rtol=1e-2, atol=1e-4)
    assert bool(ok012) and bool(ok3), "kernel output mismatch vs reference"


if __name__ == "__main__":
    key = jax.random.PRNGKey(0)
    kx, kw, kx2, kx3 = jax.random.split(key, 4)

    in_dim = 4
    batch, seq = 2, 8                      # small demo shape (N = 16 rows, last dim = 4)
    x = jax.random.normal(kx, (batch, seq, in_dim), dtype=jnp.float32)

    # Deterministic nn.Linear-style init: U(-1/sqrt(in_dim), 1/sqrt(in_dim)).
    bound = 1.0 / (in_dim ** 0.5)
    weight = jax.random.uniform(kw, (4, in_dim), dtype=jnp.float32,
                                minval=-bound, maxval=bound)

    y = math_layer_forward(x, weight)
    jax.block_until_ready(y)
    assert y.shape == (batch, seq, 4)
    _check(y, x, weight)

    # Multi-tile pipelined path: N = 4096 rows -> 128 packed rows, grid of 4 tiles,
    # N is a multiple of the packing quantum so no pad copy and no output slice.
    x2 = jax.random.normal(kx2, (2, 2048, in_dim), dtype=jnp.float32)
    y2 = math_layer_forward(x2, weight, tile_rows=32)
    jax.block_until_ready(y2)
    assert y2.shape == (2, 2048, 4)
    _check(y2, x2, weight)

    # Ragged-tail path: N = 2000 rows -> r_pad = 64 packed rows, grid = cdiv(64, 48) = 2
    # with a boundary-masked last block (exercises the no-whole-tile-padding code path).
    x3 = jax.random.normal(kx3, (2, 1000, in_dim), dtype=jnp.float32)
    y3 = math_layer_forward(x3, weight, tile_rows=48)
    jax.block_until_ready(y3)
    assert y3.shape == (2, 1000, 4)
    _check(y3, x3, weight)

    print("KERNEL_OK")
</pallas_src>

<mosaic_0001>
module attributes {stable_mosaic.version = 11 : i64} {
  func.func @math_layer_kernel(%arg0: i32, %arg1: memref<8x128xf32, #tpu.memory_space<vmem>>, %arg2: memref<128x128xf32, #tpu.memory_space<vmem>>, %arg3: memref<8x128xf32, #tpu.memory_space<vmem>>) attributes {dimension_semantics = [#tpu.dimension_semantics<parallel>], iteration_bounds = array<i64: 1>, scalar_prefetch = 0 : i64, scratch_operands = 0 : i64, tpu.core_type = #tpu.core_type<tc>, window_params = [{transform_indices = @transform_0, window_bounds = array<i64: 8, 128>}, {pipeline_mode = #tpu.pipeline_mode<synchronous>, transform_indices = @transform_1, window_bounds = array<i64: 128, 128>}, {transform_indices = @transform_2, window_bounds = array<i64: 8, 128>}]} {
    %c0 = arith.constant 0 : index
    %c0_0 = arith.constant 0 : index
    %0 = vector.load %arg1[%c0, %c0_0] : memref<8x128xf32, #tpu.memory_space<vmem>>, vector<8x128xf32>
    %c0_1 = arith.constant 0 : index
    %c0_2 = arith.constant 0 : index
    %1 = vector.load %arg2[%c0_1, %c0_2] : memref<128x128xf32, #tpu.memory_space<vmem>>, vector<128x128xf32>
    %cst = arith.constant dense<0.000000e+00> : vector<8x128xf32>
    %2 = tpu.matmul %0, %1, %cst {dimension_numbers = #tpu.dot_dimension_numbers<[1], [0], [0], [1], [0, 0, 1, 1], [], []>, precision = #tpu.contract_precision<fp32>} : vector<8x128xf32>, vector<128x128xf32>, vector<8x128xf32> -> vector<8x128xf32>
    %3 = tpu.iota {dimensions = array<i32: 1>} : vector<1x128xi32>
    %c4_i32 = arith.constant 4 : i32
    %c0_i32 = arith.constant 0 : i32
    %4 = arith.cmpi eq, %c4_i32, %c0_i32 : i32
    %c1_i32 = arith.constant 1 : i32
    %5 = arith.select %4, %c1_i32, %c4_i32 : i32
    %6 = vector.broadcast %5 : i32 to vector<1x128xi32>
    %7 = arith.remsi %3, %6 : vector<1x128xi32>
    %c0_i32_3 = arith.constant 0 : i32
    %8 = vector.broadcast %c0_i32_3 : i32 to vector<1x128xi32>
    %9 = arith.cmpi ne, %7, %8 : vector<1x128xi32>
    %c0_i32_4 = arith.constant 0 : i32
    %10 = vector.broadcast %c0_i32_4 : i32 to vector<1x128xi32>
    %11 = arith.cmpi slt, %7, %10 : vector<1x128xi32>
    %c0_i32_5 = arith.constant 0 : i32
    %12 = arith.cmpi slt, %5, %c0_i32_5 : i32
    %13 = vector.broadcast %12 : i1 to vector<1x128xi1>
    %14 = vector.broadcast %13 : vector<1x128xi1> to vector<1x128xi1>
    %15 = arith.xori %11, %14 : vector<1x128xi1>
    %16 = arith.andi %15, %9 : vector<1x128xi1>
    %17 = vector.broadcast %5 : i32 to vector<1x128xi32>
    %18 = arith.addi %7, %17 : vector<1x128xi32>
    %19 = arith.select %16, %18, %7 : vector<1x128xi1>, vector<1x128xi32>
    %cst_6 = arith.constant 4.000000e+00 : f32
    %20 = vector.broadcast %cst_6 : f32 to vector<8x128xf32>
    %21 = arith.minimumf %2, %20 : vector<8x128xf32>
    %22 = math.exp %21 : vector<8x128xf32>
    %23 = math.sin %2 : vector<8x128xf32>
    %cst_7 = arith.constant 5.000000e-03 : f32
    %24 = vector.broadcast %cst_7 : f32 to vector<8x128xf32>
    %25 = arith.maximumf %2, %24 : vector<8x128xf32>
    %26 = math.log %25 : vector<8x128xf32>
    %c1_i32_8 = arith.constant 1 : i32
    %27 = vector.broadcast %c1_i32_8 : i32 to vector<1x128xi32>
    %28 = arith.cmpi eq, %19, %27 : vector<1x128xi32>
    %29 = vector.shape_cast %28 : vector<1x128xi1> to vector<1x128xi1>
    %30 = vector.broadcast %29 : vector<1x128xi1> to vector<8x128xi1>
    %31 = arith.select %30, %22, %2 : vector<8x128xi1>, vector<8x128xf32>
    %c2_i32 = arith.constant 2 : i32
    %32 = vector.broadcast %c2_i32 : i32 to vector<1x128xi32>
    %33 = arith.cmpi eq, %19, %32 : vector<1x128xi32>
    %34 = vector.shape_cast %33 : vector<1x128xi1> to vector<1x128xi1>
    %35 = vector.broadcast %34 : vector<1x128xi1> to vector<8x128xi1>
    %36 = arith.select %35, %23, %31 : vector<8x128xi1>, vector<8x128xf32>
    %c3_i32 = arith.constant 3 : i32
    %37 = vector.broadcast %c3_i32 : i32 to vector<1x128xi32>
    %38 = arith.cmpi eq, %19, %37 : vector<1x128xi32>
    %39 = vector.shape_cast %38 : vector<1x128xi1> to vector<1x128xi1>
    %40 = vector.broadcast %39 : vector<1x128xi1> to vector<8x128xi1>
    %41 = arith.select %40, %26, %36 : vector<8x128xi1>, vector<8x128xf32>
    %c0_9 = arith.constant 0 : index
    %c0_10 = arith.constant 0 : index
    %42 = vector.load %arg3[%c0_9, %c0_10] : memref<8x128xf32, #tpu.memory_space<vmem>>, vector<8x128xf32>
    tpu.vector_store %arg3[%c0_9, %c0_10], %41 {strides = array<i32>} : memref<8x128xf32, #tpu.memory_space<vmem>>, vector<8x128xf32>,
    return
  }
  func.func @transform_0(%arg0: i32) -> (i32, i32) {
    %c0_i32 = arith.constant 0 : i32
    %c0_i32_0 = arith.constant 0 : i32
    return %arg0, %c0_i32 : i32, i32
  }
  func.func @transform_1(%arg0: i32) -> (i32, i32) {
    %c0_i32 = arith.constant 0 : i32
    %c0_i32_0 = arith.constant 0 : i32
    %c0_i32_1 = arith.constant 0 : i32
    return %c0_i32, %c0_i32_0 : i32, i32
  }
  func.func @transform_2(%arg0: i32) -> (i32, i32) {
    %c0_i32 = arith.constant 0 : i32
    %c0_i32_0 = arith.constant 0 : i32
    return %arg0, %c0_i32 : i32, i32
  }
}

</mosaic_0001>

<bundles_post_ra>
// kernel: tpu_custom_call.1
= control target key start
LH: loop header
LB: loop body
LE: loop exit
PB: predicated region body
PF: predicated region fallthrough
CT: control target
= control target key end

     0   :  { %7 = vsyncpa [#allocation3], 0  ;;  %s1759_s0 = inlined_call_operand.hbm [shape: f32[8,128], index: 0, kind: input, shape index: {}]   ;;  %s1760_s1 = inlined_call_operand.hbm [shape: f32[128,128], index: 1, kind: input, shape index: {}]   ;;  %s1761_s2 = inlined_call_operand.hbm [shape: f32[8,128], index: 2, kind: output, shape index: {}]  }
   0x1   :  { %8 = vsyncpa [#allocation6], 0 }
   0x2   :  { %9 = vsyncpa [#allocation4], 0  ;;  %s1416_s9 = smov [#allocation2]   ;;  %s1417_s11 = smov [#allocation5]  }
   0x3   :  { %s16_s10 = sshll.u32 %s1416_s9, 4  ;;  %s25_s12 = sshll.u32 %s1417_s11, 4  ;;  %s17_s10 = int_to_ptr.vmem [resolvable:$true] %s16_s10  ;;  %s1445_s12 = int_to_ptr.vmem [resolvable:$true] %s25_s12 }
   0x4   :  { %s1344_s15 = scalar_lea.hbm %s1759_s0, 128 }
   0x5   :  { %p1345_p0 = scmp.ne.s32.totalorder %s1759_s0, %s1344_s15  ;;  %p1348_p1 = scmp.lt.u32.totalorder %s1344_s15, %s1759_s0 }
   0x7   :  { %p1350_p2 = pnand %p1348_p1, %p1345_p0 }
   0x9   :  { %1353 = shalt.err (!%p1350_p2)
}
   0xa   :  { %s1354_s20 = scalar_lea.vmem %s17_s10, 128  ;;  %p1359_p4 = scmp.lt.s32.totalorder %s17_s10, %s17_s10 }
   0xb   :  { %p1355_p3 = scmp.ne.s32.totalorder %s17_s10, %s1354_s20  ;;  %p1360_p5 = scmp.lt.s32.totalorder %s1354_s20, %s1354_s20 }
   0xd   :  { %p1361_p6 = por %p1360_p5, %p1359_p4 }
   0xf   :  { %p1362_p7 = pnand %p1361_p6, %p1355_p3 }
  0x11   :  { %1365 = shalt.err (!%p1362_p7)
}
  0x12   :  { %19 = dma.hbm_to_vmem [thread:$0]  %s1759_s0, 128, %s17_s10, [#allocation3]  }
  0x13   :  { %s1366_s25 = scalar_lea.hbm %s1760_s1, 2048 }
  0x14   :  { %p1367_p8 = scmp.ne.s32.totalorder %s1760_s1, %s1366_s25  ;;  %p1370_p9 = scmp.lt.u32.totalorder %s1366_s25, %s1760_s1 }
  0x16   :  { %p1372_p10 = pnand %p1370_p9, %p1367_p8 }
  0x18   :  { %1375 = shalt.err (!%p1372_p10)
}
  0x19   :  { %s1376_s30 = scalar_lea.vmem %s1445_s12, 2048  ;;  %p1381_p12 = scmp.lt.s32.totalorder %s1445_s12, %s1445_s12 }
  0x1a   :  { %p1377_p11 = scmp.ne.s32.totalorder %s1445_s12, %s1376_s30  ;;  %p1382_p13 = scmp.lt.s32.totalorder %s1376_s30, %s1376_s30 }
  0x1c   :  { %p1383_p0 = por %p1382_p13, %p1381_p12 }
  0x1e   :  { %p1384_p1 = pnand %p1383_p0, %p1377_p11 }
  0x20   :  { %1387 = shalt.err (!%p1384_p1)
}
  0x21   :  { %s1418_s0 = smov 128   ;;  %s1419_s3 = smov 8  }
  0x22   :  { %31 = dma.hbm_to_vmem [thread:$0]  %s1760_s1, 2048, %s1445_s12, [#allocation6], %s1418_s0, %s1418_s0, %s1419_s3  }
  0x23   :  { %1410 = dma.done.wait [#allocation3], 128  }
  0x24   :  { %1411 = vsyncadd [#allocation3], 4294967168 }
  0x25   :  { %1412 = dma.done.wait [#allocation6], 2048  }
  0x26   :  { %1413 = vsyncadd [#allocation6], 4294965248  ;;  %v1420_v0 = vmov 0.0|0.0   ;;  %vm1421_vm0 = vmmov 0   ;;  %v1422_v1 = vmov 0.0   ;;  %v39_v2 = vld [vmem:[#allocation5] sm:$0xff] }
  0x27   :  { %1165 = vmatprep.subr.bf16.mxu1 %v1420_v0  ;;  %1237 = vmatprep.subr.bf16.mxu0 %v1420_v0  ;;  %v40_v3 = vld [vmem:[#allocation5 + $0x8] sm:$0xff]  ;;  %v41_v4 = vld [vmem:[#allocation5 + $0x10] sm:$0xff]  ;;  %v56_v5 = vand.u32 4294901760, %v39_v2  ;;  %v42_v7 = vld [vmem:[#allocation5 + $0x18] sm:$0xff]  ;;  %s1429_s1 = smov [#allocation7]  }
  0x28   :  { %987 = vmatprep.mubr.msk.f32.mxu1 %vm1421_vm0, %v1422_v1  ;;  %1092 = vmatprep.mubr.msk.f32.mxu0 %vm1421_vm0, %v1422_v1  ;;  %v59_v6 = vand.u32 4294901760, %v40_v3  ;;  %v62_v8 = vand.u32 4294901760, %v41_v4  ;;  %v65_v9 = vand.u32 4294901760, %v42_v7  ;;  %v43_v10 = vld [vmem:[#allocation5 + $0x20] sm:$0xff]  ;;  %v44_v11 = vld [vmem:[#allocation5 + $0x28] sm:$0xff]  ;;  %v45_v16 = vld [vmem:[#allocation5 + $0x30] sm:$0xff] }
  0x29   :  { %v68_v14 = vand.u32 4294901760, %v43_v10  ;;  %v71_v15 = vand.u32 4294901760, %v44_v11  ;;  %v46_v17 = vld [vmem:[#allocation5 + $0x38] sm:$0xff]  ;;  %v74_v19 = vand.u32 4294901760, %v45_v16  ;;  %v1496_v21 = vld [vmem:[#allocation5 + $0x40] sm:$0xff]  ;;  %v1498_v22 = vld [vmem:[#allocation5 + $0x48] sm:$0xff]  ;;  %v1512_v29 = vsub.f32 %v39_v2, %v56_v5 }
  0x2a   :  { %v1482_v12 = vpack.c.bf16 %v59_v6, %v56_v5  ;;  %v1486_v13 = vpack.c.bf16 %v65_v9, %v62_v8  ;;  %v77_v20 = vand.u32 4294901760, %v46_v17  ;;  %v80_v24 = vand.u32 4294901760, %v1496_v21  ;;  %v38_v26 = vld [vmem:[#allocation2] sm:$0xff]  ;;  %v1508_v27 = vld [vmem:[#allocation5 + $0x50] sm:$0xff]  ;;  %v1524_v35 = vld [vmem:[#allocation5 + $0x60] sm:$0xff]  ;;  %s839_s6 = sshll.u32 %s1429_s1, 4  ;;  %s840_s6 = int_to_ptr.vmem [resolvable:$true] %s839_s6 }
  0x2b   :  { %v1492_v18 = vpack.c.bf16 %v71_v15, %v68_v14  ;;  %v83_v25 = vand.u32 4294901760, %v1498_v22  ;;  %v1510_v28 = vld [vmem:[#allocation5 + $0x58] sm:$0xff]  ;;  %v1514_v30 = vand.u32 4294901760, %v38_v26  ;;  %v1516_v31 = vsub.f32 %v40_v3, %v59_v6  ;;  %v1528_v36 = vld [vmem:[#allocation5 + $0x68] sm:$0xff]  ;;  %v1547_v43 = vld [vmem:[#allocation5 + $0x70] sm:$0xff]  ;;  %s1388_s7 = scalar_lea.vmem %s840_s6, 128  ;;  %p1393_p3 = scmp.lt.s32.totalorder %s840_s6, %s840_s6 }
  0x2c   :  { %1167 = vmatpush3.bf16.msra.mxu1 %v1482_v12  ;;  %1239 = vmatpush3.bf16.msra.mxu0 %v1482_v12  ;;  %v1502_v23 = vpack.c.bf16 %v77_v20, %v74_v19  ;;  %v86_v33 = vand.u32 4294901760, %v1508_v27  ;;  %v89_v34 = vand.u32 4294901760, %v1510_v28  ;;  %v1530_v37 = vsub.f32 %v41_v4, %v62_v8  ;;  %v1549_v44 = vld [vmem:[#allocation5 + $0x78] sm:$0xff]  ;;  %p1389_p2 = scmp.ne.s32.totalorder %s840_s6, %s1388_s7  ;;  %p1394_p4 = scmp.lt.s32.totalorder %s1388_s7, %s1388_s7 }
  0x2d   :  { %1168 = vmatprep.subr.bf16.mxu1 %v1420_v0  ;;  %1240 = vmatprep.subr.bf16.mxu0 %v1420_v0  ;;  %v1520_v32 = vpack.c.bf16 %v83_v25, %v80_v24  ;;  %v1532_v38 = vsub.f32 %v42_v7, %v65_v9  ;;  %v92_v39 = vand.u32 4294901760, %v1524_v35  ;;  %v1536_v40 = vsub.f32 %v38_v26, %v1514_v30 }
  0x2e   :  { %v1544_v41 = vpack.c.bf16 %v89_v34, %v86_v33  ;;  %v95_v42 = vand.u32 4294901760, %v1528_v36  ;;  %v149_v45 = vand.u32 4294901760, %v1512_v29  ;;  %v156_v46 = vand.u32 4294901760, %v1516_v31  ;;  %p1395_p5 = por %p1394_p4, %p1393_p3 }
  0x2f   :  { %v1555_v47 = vsub.f32 %v43_v10, %v68_v14  ;;  %v1557_v48 = vsub.f32 %v44_v11, %v71_v15  ;;  %v98_v49 = vand.u32 4294901760, %v1547_v43  ;;  %v101_v50 = vand.u32 4294901760, %v1549_v44 }
  0x30   :  { %1170 = vmatpush3.bf16.msra.mxu1 %v1486_v13  ;;  %1242 = vmatpush3.bf16.msra.mxu0 %v1486_v13  ;;  %v138_v51 = vand.u32 4294901760, %v1536_v40  ;;  %v163_v52 = vand.u32 4294901760, %v1530_v37  ;;  %v1569_v53 = vpack.c.bf16 %v95_v42, %v92_v39  ;;  %v150_v54 = vsub.f32 %v1512_v29, %v149_v45  ;;  %p1396_p6 = pnand %p1395_p5, %p1389_p2 }
  0x31   :  { %1171 = vmatprep.subr.bf16.mxu1 %v1420_v0  ;;  %1243 = vmatprep.subr.bf16.mxu0 %v1420_v0  ;;  %v157_v55 = vsub.f32 %v1516_v31, %v156_v46  ;;  %v170_v56 = vand.u32 4294901760, %v1532_v38  ;;  %v1576_v57 = vsub.f32 %v45_v16, %v74_v19  ;;  %v1578_v58 = vsub.f32 %v46_v17, %v77_v20 }
  0x32   :  { %v139_v59 = vsub.f32 %v1536_v40, %v138_v51  ;;  %v164_v60 = vsub.f32 %v1530_v37, %v163_v52  ;;  %v177_v61 = vand.u32 4294901760, %v1555_v47  ;;  %v184_v62 = vand.u32 4294901760, %v1557_v48 }
  0x33   :  { %v1590_v63 = vpack.c.bf16 %v101_v50, %v98_v49  ;;  %v151_v2 = vand.u32 4294901760, %v150_v54  ;;  %v158_v3 = vand.u32 4294901760, %v157_v55  ;;  %v171_v4 = vsub.f32 %v1532_v38, %v170_v56 }
  0x34   :  { %1173 = vmatpush3.bf16.msra.mxu1 %v1492_v18  ;;  %1245 = vmatpush3.bf16.msra.mxu0 %v1492_v18  ;;  %v1596_v5 = vsub.f32 %v1496_v21, %v80_v24  ;;  %v1599_v6 = vsub.f32 %v1498_v22, %v83_v25  ;;  %v1262_v7 = vpack.c.bf16 %v156_v46, %v149_v45  ;;  %v140_v8 = vand.u32 4294901760, %v139_v59 }
  0x35   :  { %1174 = vmatprep.subr.bf16.mxu1 %v1420_v0  ;;  %1246 = vmatprep.subr.bf16.mxu0 %v1420_v0  ;;  %v165_v9 = vand.u32 4294901760, %v164_v60  ;;  %v178_v10 = vsub.f32 %v1555_v47, %v177_v61  ;;  %v185_v11 = vsub.f32 %v1557_v48, %v184_v62  ;;  %v1190_v14 = vpack.c.bf16 %v158_v3, %v151_v2 }
  0x36   :  { %v172_v15 = vand.u32 4294901760, %v171_v4  ;;  %v191_v16 = vand.u32 4294901760, %v1576_v57  ;;  %v198_v17 = vand.u32 4294901760, %v1578_v58  ;;  %v1612_v19 = vsub.f32 %v1508_v27, %v86_v33 }
  0x37   :  { %v1617_v20 = vsub.f32 %v1510_v28, %v89_v34  ;;  %v1265_v21 = vpack.c.bf16 %v170_v56, %v163_v52  ;;  %v179_v22 = vand.u32 4294901760, %v178_v10  ;;  %v186_v24 = vand.u32 4294901760, %v185_v11 }
  0x38   :  { %1176 = vmatpush3.bf16.msra.mxu1 %v1502_v23  ;;  %1248 = vmatpush3.bf16.msra.mxu0 %v1502_v23  ;;  %v205_v25 = vand.u32 4294901760, %v1596_v5  ;;  %v1193_v26 = vpack.c.bf16 %v172_v15, %v165_v9  ;;  %v192_v45 = vsub.f32 %v1576_v57, %v191_v16  ;;  %v199_v27 = vsub.f32 %v1578_v58, %v198_v17 }
  0x39   :  { %1177 = vmatprep.subr.bf16.mxu1 %v1420_v0  ;;  %1249 = vmatprep.subr.bf16.mxu0 %v1420_v0  ;;  %v212_v33 = vand.u32 4294901760, %v1599_v6  ;;  %v1628_v28 = vsub.f32 %v1524_v35, %v92_v39  ;;  %v1633_v34 = vsub.f32 %v1528_v36, %v95_v42  ;;  %v1196_v46 = vpack.c.bf16 %v186_v24, %v179_v22 }
  0x3a   :  { %v206_v52 = vsub.f32 %v1596_v5, %v205_v25  ;;  %v219_v54 = vand.u32 4294901760, %v1612_v19  ;;  %v193_v35 = vand.u32 4294901760, %v192_v45  ;;  %v200_v39 = vand.u32 4294901760, %v199_v27 }
  0x3b   :  { %v213_v55 = vsub.f32 %v1599_v6, %v212_v33  ;;  %v226_v36 = vand.u32 4294901760, %v1617_v20  ;;  %v1648_v42 = vsub.f32 %v1547_v43, %v98_v49  ;;  %v1653_v56 = vsub.f32 %v1549_v44, %v101_v50 }
  0x3c   :  { %1179 = vmatpush3.bf16.msra.mxu1 %v1520_v32  ;;  %1251 = vmatpush3.bf16.msra.mxu0 %v1520_v32  ;;  %v1271_v59 = vpack.c.bf16 %v198_v17, %v191_v16  ;;  %v207_v60 = vand.u32 4294901760, %v206_v52  ;;  %v1199_v2 = vpack.c.bf16 %v200_v39, %v193_v35  ;;  %v240_v43 = vand.u32 4294901760, %v1633_v34 }
  0x3d   :  { %1180 = vmatprep.subr.bf16.mxu1 %v1420_v0  ;;  %1252 = vmatprep.subr.bf16.mxu0 %v1420_v0  ;;  %v214_v3 = vand.u32 4294901760, %v213_v55  ;;  %v227_v4 = vsub.f32 %v1617_v20, %v226_v36  ;;  %v1274_v44 = vpack.c.bf16 %v212_v33, %v205_v25  ;;  %v254_v11 = vand.u32 4294901760, %v1653_v56 }
  0x3e   :  { %v241_v10 = vsub.f32 %v1633_v34, %v240_v43  ;;  %v1425_v52 = vmov 2131351028   ;;  %v1426_v39 = vmov 2102212464  }
  0x3f   :  { %v228_v9 = vand.u32 4294901760, %v227_v4  ;;  %v255_v22 = vsub.f32 %v1653_v56, %v254_v11 }
  0x40   :  { %1182 = vmatpush3.bf16.msra.mxu1 %v1544_v41  ;;  %1254 = vmatpush3.bf16.msra.mxu0 %v1544_v41  ;;  %v242_v17 = vand.u32 4294901760, %v241_v10 }
  0x41   :  { %1183 = vmatprep.subr.bf16.mxu1 %v1420_v0  ;;  %1255 = vmatprep.subr.bf16.mxu0 %v1420_v0  ;;  %v256_v45 = vand.u32 4294901760, %v255_v22 }
  0x44   :  { %1185 = vmatpush3.bf16.msra.mxu1 %v1569_v53  ;;  %1257 = vmatpush3.bf16.msra.mxu0 %v1569_v53 }
  0x45   :  { %1186 = vmatprep.subr.bf16.mxu1 %v1420_v0  ;;  %1258 = vmatprep.subr.bf16.mxu0 %v1420_v0 }
  0x48   :  { %1188 = vmatpush3.bf16.msra.mxu1 %v1590_v63  ;;  %1260 = vmatpush3.bf16.msra.mxu0 %v1590_v63 }
  0x49   :  { %1189 = vmatprep.subr.bf16.mxu1 %v1420_v0  ;;  %1261 = vmatprep.subr.bf16.mxu0 %v1420_v0 }
  0x4b   :  { %988 = vmatmul.mubr.f32.vlgmr.msra.gmra.mrb[0].mxu1 %v140_v8  ;;  %1093 = vmatmul.mubr.f32.vlgmr.msra.gmra.mrb[0].mxu0 %v138_v51  ;;  %v1268_v51 = vpack.c.bf16 %v184_v62, %v177_v61  ;;  %v220_v61 = vsub.f32 %v1612_v19, %v219_v54  ;;  %v233_v62 = vand.u32 4294901760, %v1628_v28  ;;  %v1202_v8 = vpack.c.bf16 %v214_v3, %v207_v60 }
  0x4c   :  { %1191 = vmatpush3.bf16.msra.mxu1 %v1190_v14  ;;  %1263 = vmatpush3.bf16.msra.mxu0 %v1262_v7  ;;  %v247_v7 = vand.u32 4294901760, %v1648_v42  ;;  %v1277_v14 = vpack.c.bf16 %v226_v36, %v219_v54  ;;  %v1428_v60 = vmov 1326507024  }
  0x4d   :  { %1192 = vmatprep.subr.bf16.mxu1 %v1420_v0  ;;  %1264 = vmatprep.subr.bf16.mxu0 %v1420_v0  ;;  %v221_v49 = vand.u32 4294901760, %v220_v61  ;;  %v234_v50 = vsub.f32 %v1628_v28, %v233_v62  ;;  %v1280_v25 = vpack.c.bf16 %v240_v43, %v233_v62 }
  0x4e   :  { %1022 = vmatprep.mubr.msk.f32.mxu1 %vm1421_vm0, %v1422_v1  ;;  %1127 = vmatprep.mubr.msk.f32.mxu0 %vm1421_vm0, %v1422_v1  ;;  %v1283_v33 = vpack.c.bf16 %v254_v11, %v247_v7 }
  0x4f   :  { %v235_v15 = vand.u32 4294901760, %v234_v50  ;;  %v1205_v16 = vpack.c.bf16 %v228_v9, %v221_v49 }
  0x50   :  { %1194 = vmatpush3.bf16.msra.mxu1 %v1193_v26  ;;  %1266 = vmatpush3.bf16.msra.mxu0 %v1265_v21  ;;  %v248_v21 = vsub.f32 %v1648_v42, %v247_v7 }
  0x51   :  { %1195 = vmatprep.subr.bf16.mxu1 %v1420_v0  ;;  %1267 = vmatprep.subr.bf16.mxu0 %v1420_v0  ;;  %v1208_v24 = vpack.c.bf16 %v242_v17, %v235_v15 }
  0x52   :  { %v249_v26 = vand.u32 4294901760, %v248_v21 }
  0x54   :  { %1197 = vmatpush3.bf16.msra.mxu1 %v1196_v46  ;;  %1269 = vmatpush3.bf16.msra.mxu0 %v1268_v51  ;;  %v1211_v27 = vpack.c.bf16 %v256_v45, %v249_v26  ;;  %v1214_v46 = vpack.c.bf16 %v1516_v31, %v1512_v29  ;;  %v1217_v51 = vpack.c.bf16 %v1532_v38, %v1530_v37 }
  0x55   :  { %1198 = vmatprep.subr.bf16.mxu1 %v1420_v0  ;;  %1270 = vmatprep.subr.bf16.mxu0 %v1420_v0  ;;  %v1220_v29 = vpack.c.bf16 %v1557_v48, %v1555_v47 }
  0x58   :  { %1200 = vmatpush3.bf16.msra.mxu1 %v1199_v2  ;;  %1272 = vmatpush3.bf16.msra.mxu0 %v1271_v59 }
  0x59   :  { %1201 = vmatprep.subr.bf16.mxu1 %v1420_v0  ;;  %1273 = vmatprep.subr.bf16.mxu0 %v1420_v0 }
  0x5c   :  { %1203 = vmatpush3.bf16.msra.mxu1 %v1202_v8  ;;  %1275 = vmatpush3.bf16.msra.mxu0 %v1274_v44 }
  0x5d   :  { %1204 = vmatprep.subr.bf16.mxu1 %v1420_v0  ;;  %1276 = vmatprep.subr.bf16.mxu0 %v1420_v0 }
  0x60   :  { %1206 = vmatpush3.bf16.msra.mxu1 %v1205_v16  ;;  %1278 = vmatpush3.bf16.msra.mxu0 %v1277_v14 }
  0x61   :  { %1207 = vmatprep.subr.bf16.mxu1 %v1420_v0  ;;  %1279 = vmatprep.subr.bf16.mxu0 %v1420_v0 }
  0x64   :  { %1209 = vmatpush3.bf16.msra.mxu1 %v1208_v24  ;;  %1281 = vmatpush3.bf16.msra.mxu0 %v1280_v25 }
  0x65   :  { %1210 = vmatprep.subr.bf16.mxu1 %v1420_v0  ;;  %1282 = vmatprep.subr.bf16.mxu0 %v1420_v0 }
  0x68   :  { %1212 = vmatpush3.bf16.msra.mxu1 %v1211_v27  ;;  %1284 = vmatpush3.bf16.msra.mxu0 %v1283_v33 }
  0x69   :  { %1213 = vmatprep.subr.bf16.mxu1 %v1420_v0  ;;  %1285 = vmatprep.subr.bf16.mxu0 %v1420_v0 }
  0x6b   :  { %1023 = vmatmul.mubr.f32.vlgmr.msra.gmra.mrb[0].mxu1 %v1514_v30  ;;  %1128 = vmatmul.mubr.f32.vlgmr.msra.gmra.mrb[0].mxu0 %v1514_v30 }
  0x6c   :  { %1215 = vmatpush3.bf16.msra.mxu1 %v1214_v46  ;;  %1287 = vmatpush3.bf16.msra.mxu0 %v1482_v12  ;;  %v1223_v12 = vpack.c.bf16 %v1578_v58, %v1576_v57 }
  0x6d   :  { %1216 = vmatprep.subr.bf16.mxu1 %v1420_v0  ;;  %1288 = vmatprep.subr.bf16.mxu0 %v1420_v0 }
  0x6e   :  { %1057 = vmatprep.mubr.msk.f32.mxu1 %vm1421_vm0, %v1422_v1  ;;  %1162 = vmatprep.mubr.msk.f32.mxu0 %vm1421_vm0, %v1422_v1  ;;  %v1226_v1 = vpack.c.bf16 %v1599_v6, %v1596_v5  ;;  %v1423_v6 = vmov 683565275  }
  0x70   :  { %1218 = vmatpush3.bf16.msra.mxu1 %v1217_v51  ;;  %1290 = vmatpush3.bf16.msra.mxu0 %v1486_v13  ;;  %v1229_v13 = vpack.c.bf16 %v1617_v20, %v1612_v19  ;;  %v1424_v20 = vmov 2475754826  }
  0x71   :  { %1219 = vmatprep.subr.bf16.mxu1 %v1420_v0  ;;  %1291 = vmatprep.subr.bf16.mxu0 %v1420_v0 }
  0x74   :  { %1221 = vmatpush3.bf16.msra.mxu1 %v1220_v29  ;;  %1293 = vmatpush3.bf16.msra.mxu0 %v1492_v18  ;;  %v1232_v18 = vpack.c.bf16 %v1633_v34, %v1628_v28 }
  0x75   :  { %1222 = vmatprep.subr.bf16.mxu1 %v1420_v0  ;;  %1294 = vmatprep.subr.bf16.mxu0 %v1420_v0 }
  0x78   :  { %1224 = vmatpush3.bf16.msra.mxu1 %v1223_v12  ;;  %1296 = vmatpush3.bf16.msra.mxu0 %v1502_v23  ;;  %v1235_v23 = vpack.c.bf16 %v1653_v56, %v1648_v42  ;;  %v1427_v42 = vmov 920167782  }
  0x79   :  { %1225 = vmatprep.subr.bf16.mxu1 %v1420_v0  ;;  %1297 = vmatprep.subr.bf16.mxu0 %v1420_v0 }
  0x7c   :  { %1227 = vmatpush3.bf16.msra.mxu1 %v1226_v1  ;;  %1299 = vmatpush3.bf16.msra.mxu0 %v1520_v32 }
  0x7d   :  { %1228 = vmatprep.subr.bf16.mxu1 %v1420_v0  ;;  %1300 = vmatprep.subr.bf16.mxu0 %v1420_v0 }
  0x80   :  { %1230 = vmatpush3.bf16.msra.mxu1 %v1229_v13  ;;  %1302 = vmatpush3.bf16.msra.mxu0 %v1544_v41 }
  0x81   :  { %1231 = vmatprep.subr.bf16.mxu1 %v1420_v0  ;;  %1303 = vmatprep.subr.bf16.mxu0 %v1420_v0 }
  0x84   :  { %1233 = vmatpush3.bf16.msra.mxu1 %v1232_v18  ;;  %1305 = vmatpush3.bf16.msra.mxu0 %v1569_v53 }
  0x85   :  { %1234 = vmatprep.subr.bf16.mxu1 %v1420_v0  ;;  %1306 = vmatprep.subr.bf16.mxu0 %v1420_v0 }
  0x88   :  { %1236 = vmatpush3.bf16.msra.mxu1 %v1235_v23  ;;  %1308 = vmatpush3.bf16.msra.mxu0 %v1590_v63 }
  0x8b   :  { %1058 = vmatmul.mubr.f32.vlgmr.msra.gmra.mrb[0].mxu1 %v1536_v40  ;;  %1163 = vmatmul.mubr.f32.vlgmr.msra.gmra.mrb[0].mxu0 %v1514_v30 }
 0x15e   :  { %v397_v31 = vpop.f32.mrb[0].mxu1  ;;  %v692_v32 = vpop.f32.mrb[0].mxu0 }
 0x15f   :  { %v1723_v37 = vadd.f32 %v692_v32, %v397_v31  ;;  %v1059_v38 = vpop.f32.mrb[1].mxu1  ;;  %v1164_v41 = vpop.f32.mrb[1].mxu0 }
 0x161   :  { %v716_v47 = vand.u32 2139095040, %v1723_v37  ;;  %v713_v0 = vand.u32 2147483647, %v1723_v37  ;;  %vm715_vm8 = vcmp.lt.s32.totalorder %v1723_v37, 0  ;;  %vm805_vm15 = vweird.f32 %v1723_v37 }
 0x163   :  { %v717_v48 = vshrl.u32 %v716_v47, 23  ;;  %v720_v40 = vand.u32 8388607, %v713_v0  ;;  %vm714_vm9 = vcmp.le.f32.partialorder %v713_v0, 0.7853982 }
 0x165   :  { %v849_v53 = vadd.s32 4294967169, %v717_v48  ;;  %v721_v62 = vor.u32 8388608, %v720_v40 }
 0x167   :  { %v723_v57 = vadd.s32 1, %v849_v53  ;;  %v761_v15 = vshll.u32 %v721_v62, 8 }
 0x169   :  { %vm724_vm1 = vcmp.gt.s32.totalorder %v723_v57, 0 }
 0x16a   :  { %v725_v58 = vsel %vm724_vm1, %v723_v57, 0 }
 0x16b   :  { %v727_v63 = vand.u32 31, %v725_v58  ;;  %v726_v5 = vshrl.u32 %v725_v58, 5 }
 0x16d   :  { %v728_v30 = vsub.s32 32, %v727_v63  ;;  %v730_v19 = vshll.u32 %v1423_v6, %v727_v63  ;;  %v733_v28 = vshll.u32 %v1424_v20, %v727_v63  ;;  %v736_v35 = vshll.u32 %v1425_v52, %v727_v63 }
 0x16e   :  { %v739_v36 = vshll.u32 %v1426_v39, %v727_v63  ;;  %v742_v59 = vshll.u32 %v1427_v42, %v727_v63  ;;  %vm745_vm2 = vcmp.lt.s32.totalorder %v726_v5, 1  ;;  %vm748_vm3 = vcmp.lt.s32.totalorder %v726_v5, 4 }
 0x16f   :  { %v731_v34 = vshrl.u32 %v1424_v20, %v728_v30  ;;  %v734_v54 = vshrl.u32 %v1425_v52, %v728_v30  ;;  %v737_v55 = vshrl.u32 %v1426_v39, %v728_v30  ;;  %v740_v56 = vshrl.u32 %v1427_v42, %v728_v30 }
 0x170   :  { %v743_v61 = vshrl.u32 %v1428_v60, %v728_v30  ;;  %v729_v8 = vshrl.u32 %v1423_v6, %v728_v30  ;;  %vm747_vm4 = vcmp.lt.s32.totalorder %v726_v5, 3  ;;  %vm746_vm5 = vcmp.lt.s32.totalorder %v726_v5, 2 }
 0x171   :  { %v732_v2 = vor.u32 %v731_v34, %v730_v19  ;;  %v735_v3 = vor.u32 %v734_v54, %v733_v28  ;;  %v738_v4 = vor.u32 %v737_v55, %v736_v35  ;;  %v741_v43 = vor.u32 %v740_v56, %v739_v36 }
 0x172   :  { %v744_v44 = vor.u32 %v743_v61, %v742_v59  ;;  %v710_v34 = vmin.f32 %v1723_v37, 4.0  ;;  %v817_v39 = vmax.f32 %v1723_v37, 0.005  ;;  %v696_v42 = vlaneseq }
 0x173   :  { %v750_v49 = vsel %vm748_vm3, %v738_v4, 2102212464  ;;  %v753_v50 = vsel %vm745_vm2, %v732_v2, %v735_v3  ;;  %v757_v7 = vsel %vm745_vm2, %v735_v3, %v738_v4  ;;  %v754_v9 = vsel %vm748_vm3, %v741_v43, 920167782 }
 0x174   :  { %v758_v10 = vsel %vm748_vm3, %v744_v44, 1326507024  ;;  %v755_v11 = vsel %vm747_vm4, %v738_v4, %v754_v9  ;;  %v749_v16 = vsel %vm745_vm2, %v729_v8, %v732_v2  ;;  %v751_v17 = vsel %vm747_vm4, %v735_v3, %v750_v49 }
 0x175   :  { %v759_v14 = vsel %vm747_vm4, %v741_v43, %v758_v10  ;;  %v756_v21 = vsel %vm746_vm5, %v753_v50, %v755_v11  ;;  %v752_v27 = vsel %vm746_vm5, %v749_v16, %v751_v17  ;;  %v711_v55 = vmul.f32 1.442695, %v710_v34 }
 0x176   :  { %v760_v22 = vsel %vm746_vm5, %v757_v7, %v759_v14  ;;  %v1732_v26 = vmul.u32.u64.low %v761_v15, %v756_v21  ;;  %v1733_v45 = vmul.u32.u64.high %v761_v15, %v756_v21, %v1732_v26  ;;  %v768_v46 = vmul.u32 %v761_v15, %v752_v27 }
 0x177   :  { %v1729_v24 = vmul.u32.u64.low %v761_v15, %v760_v22  ;;  %v1730_v25 = vmul.u32.u64.high %v761_v15, %v760_v22, %v1729_v24  ;;  %v697_v60 = vand.u32 127, %v696_v42 }
 0x178   :  { %v771_v33 = vadd.s32 1, %v1733_v45 }
 0x179   :  { %vm770_vm6 = vc.u32 %v1730_v25, %v1732_v26  ;;  %v769_v47 = vadd.s32 %v1732_v26, %v1730_v25  ;;  %v702_v62 = vand.u32 3, %v697_v60 }
 0x17a   :  { %v772_v51 = vsel %vm770_vm6, %v771_v33, %v1733_v45 }
 0x17b   :  { %v773_v29 = vadd.s32 %v772_v51, %v768_v46  ;;  %vm820_vm12 = vcmp.eq.s32.totalorder %v702_v62, 1  ;;  %vm824_vm14 = vcmp.eq.s32.totalorder %v702_v62, 2  ;;  %vm828_vm0 = vcmp.eq.s32.totalorder %v702_v62, 3 }
 0x17d   :  { %v774_v12 = vadd.s32 536870912, %v773_v29 }
 0x17f   :  { %v775_v1 = vshrl.u32 %v774_v12, 30 }
 0x181   :  { %v776_v13 = vshll.u32 %v775_v1, 30  ;;  %v799_v28 = vsub.s32 4, %v775_v1 }
 0x183   :  { %v777_v18 = vsub.s32 %v773_v29, %v776_v13  ;;  %v800_v35 = vsel %vm715_vm8, %v799_v28, %v775_v1 }
 0x184   :  { %v802_v56 = vsel %vm714_vm9, 0, %v800_v35 }
 0x185   :  { %v779_v23 = vsub.s32 0, %v777_v18  ;;  %v806_v59 = vadd.s32 3, %v802_v56 }
 0x187   :  { %v850_v31 = vmin.u32 %v779_v23, %v777_v18  ;;  %v807_v61 = vand.u32 3, %v806_v59 }
 0x189   :  { %v781_v32 = vclz %v850_v31  ;;  %vm812_vm10 = vcmp.eq.s32.totalorder %v807_v61, 2  ;;  %vm809_vm11 = vcmp.eq.s32.totalorder %v807_v61, 0  ;;  %vm808_vm13 = vcmp.lt.s32.totalorder %v807_v61, 2 }
 0x18b   :  { %v851_v38 = vadd.s32 4294967294, %v781_v32 }
 0x18d   :  { %vm852_vm7 = vcmp.lt.s32.totalorder %v851_v38, 0 }
 0x18e   :  { %v784_v41 = vsel %vm852_vm7, 0, %v851_v38 }
 0x18f   :  { %v785_v48 = vsub.s32 32, %v784_v41  ;;  %v789_v53 = vsub.s32 4294967266, %v784_v41  ;;  %v786_v57 = vshll.u32 %v777_v18, %v784_v41 }
 0x191   :  { %v787_v58 = vshrl.u32 %v769_v47, %v785_v48  ;;  %v790_v63 = vadd.s32 127, %v789_v53 }
 0x193   :  { %v788_v40 = vor.u32 %v787_v58, %v786_v57  ;;  %v791_v30 = vshll.u32 %v790_v63, 23 }
 0x195   :  { %v792_v5 = vor.u32 4788187, %v791_v30  ;;  %v795_v19 = vcvt.s32.f32 %v788_v40 }
 0x197   :  { %v793_v6 = vand.u32 2147483647, %v792_v5 }
 0x199   :  { %v796_v20 = vmul.f32 %v795_v19, %v793_v6 }
 0x19b   :  { %v797_v52 = vxor.u32 2147483648, %v796_v20 }
 0x19d   :  { %v798_v54 = vsel %vm715_vm8, %v797_v52, %v796_v20 }
 0x19e   :  { %v801_v36 = vsel %vm714_vm9, %v1723_v37, %v798_v54 }
 0x19f   :  { %1336 = vcosq.f32 %v801_v36 }
 0x1a0   :  { %1338 = vsinq.f32 %v801_v36 }
 0x1a1   :  { %1340 = vlog2.f32 %v817_v39 }
 0x1a2   :  { %1342 = vpow2.f32 %v711_v55 }
 0x1a9   :  { %v1337_v2 = vpop.eup %1336 }
 0x1aa   :  { %v1339_v3 = vpop.eup %1338  ;;  %v813_v0 = vxor.u32 2147483648, %v1337_v2 }
 0x1ab   :  { %v1341_v4 = vpop.eup %1340  ;;  %v810_v43 = vxor.u32 2147483648, %v1339_v3 }
 0x1ac   :  { %v1343_v44 = vpop.eup %1342  ;;  %v814_v49 = vsel %vm812_vm10, %v813_v0, %v1339_v3  ;;  %v819_v9 = vmul.f32 0.6931472, %v1341_v4 }
 0x1ad   :  { %v811_v50 = vsel %vm809_vm11, %v1337_v2, %v810_v43  ;;  %v823_v10 = vsel %vm820_vm12, %v1343_v44, %v1723_v37 }
 0x1ae   :  { %v815_v7 = vsel %vm808_vm13, %v811_v50, %v814_v49 }
 0x1af   :  { %v816_v8 = vsel %vm805_vm15, nan, %v815_v7 }
 0x1b0   :  { %v827_v11 = vsel %vm824_vm14, %v816_v8, %v823_v10 }
 0x1b1   :  { %v831_v14 = vsel %vm828_vm0, %v819_v9, %v827_v11 }
 0x1b2   :  { %832 = vst [vmem:[#allocation7] sm:$0xff] %v831_v14 }
 0x1b3   :  { %1399 = shalt.err (!%p1396_p6)
}
 0x1b4   :  { %s1400_s10 = scalar_lea.hbm %s1761_s2, 128 }
 0x1b5   :  { %p1401_p7 = scmp.ne.s32.totalorder %s1761_s2, %s1400_s10  ;;  %p1404_p8 = scmp.lt.u32.totalorder %s1400_s10, %s1761_s2 }
 0x1b7   :  { %p1406_p9 = pnand %p1404_p8, %p1401_p7 }
 0x1b9   :  { %1409 = shalt.err (!%p1406_p9)
}
 0x1ba   :  { %842 = dma.vmem_to_hbm [thread:$0]  %s840_s6, 128, %s1761_s2, [#allocation4]  }
 0x1bb   :  { %1414 = dma.done.wait [#allocation4], 128  }
 0x1bc   :  { %1415 = vsyncadd [#allocation4], 4294967168 }
 0x1bd   :  { %846 = vsyncpa [#allocation3], 1 }
 0x1be   :  { %847 = vsyncpa [#allocation6], 1 }
 0x1bf   :  { %848 = vsyncpa [#allocation4], 1 }

</bundles_post_ra>
